<compile_context>
chip_gen: v7x
topology: tpu7x:2x2x1
jax: 0.10.0
libtpu: 0.0.40
codegen_flags: <defaults>
</compile_context>

<pallas_src>
import functools

import jax
import jax.numpy as jnp
from jax.experimental import pallas as pl
from jax.experimental.pallas import tpu as pltpu


def _round_up(x: int, m: int) -> int:
    return ((x + m - 1) // m) * m


def _vmem_capacity_bytes() -> int:
    """Physical VMEM of the local TPU generation (v5e/v6e: 128 MiB, v7x: 64 MiB)."""
    try:
        cap = int(getattr(pltpu.get_tpu_info(), "vmem_capacity_bytes", 0))
        if cap > 0:
            return cap
    except Exception:
        pass
    return 64 * 1024 * 1024  # conservative fallback: assume the smallest (v7x) VMEM


def _diphone_kernel(
    x_ref,       # [tn, F]   f32  (cast to bf16 in-kernel; no wrapper HBM cast pass)
    emb_ref,     # [tn, E]   f32
    w0_ref,      # [F,  2H]  bf16  = concat([wl0 | wc0_feat])
    we_ref,      # [E,  2H]  bf16  = concat([0   | wc0_emb ])
    b0_ref,      # [1,  2H]  f32   = concat([bl0 | bc0])
    w1_ref,      # [2H, 2H]  bf16  = block_diag(wl1, wc1)
    b1_ref,      # [1,  2H]  f32   = concat([bl1 | bc1])
    woc_ref,     # [2H, C]   bf16  (rows [H:2H] = wc_out, rows [0:H] = 0)
    boc_ref,     # [1,  C]   f32
    wol_ref,     # [2H, L]   bf16  (rows [0:H] = wl_out, rows [H:2H] = 0)
    bol_ref,     # [1,  L]   f32
    out_c_ref,   # [tn, C]   out_dtype (default bf16)
    out_l_ref,   # [tn, L]   out_dtype (default bf16)
):
    cdt = w0_ref.dtype
    x = x_ref[...].astype(cdt)
    e = emb_ref[...].astype(cdt)

    # fused first layer: [left hidden | center hidden]; emb only feeds the center half
    h0 = (
        jnp.dot(x, w0_ref[...], preferred_element_type=jnp.float32)
        + jnp.dot(e, we_ref[...], preferred_element_type=jnp.float32)
        + b0_ref[...]
    )
    h0 = jnp.maximum(h0, 0.0).astype(cdt)            # ReLU; dropout == identity (eval)

    # fused second layer (block-diagonal: the two MLPs stay independent)
    h1 = jnp.dot(h0, w1_ref[...], preferred_element_type=jnp.float32) + b1_ref[...]
    h1 = jnp.maximum(h1, 0.0).astype(cdt)

    # output layers: two exact-width stores -> no post-kernel slicing / copies needed
    out_c_ref[...] = (
        jnp.dot(h1, woc_ref[...], preferred_element_type=jnp.float32) + boc_ref[...]
    ).astype(out_c_ref.dtype)
    out_l_ref[...] = (
        jnp.dot(h1, wol_ref[...], preferred_element_type=jnp.float32) + bol_ref[...]
    ).astype(out_l_ref.dtype)


@functools.partial(jax.jit, static_argnames=("row_tile", "out_dtype"))
def factored_diphone_forward(
    features, contexts_left, params, *, row_tile: int = 4096, out_dtype=jnp.bfloat16
):
    """features: [B, T, F] f32; contexts_left: [B, T] int.
    Returns (logits_center [B,T,num_center], logits_left [B,T,num_contexts],
             contexts_embedded_left [B,T,E]) -- eval-mode forward_factored semantics.
    Logits are returned in `out_dtype` (default bf16; pass jnp.float32 for full precision)."""
    compute_dtype = jnp.bfloat16
    f32 = jnp.float32

    B, T, F = features.shape
    N = B * T

    emb_table = params["embedding"]                      # [C, E]
    num_contexts, emb_dim = emb_table.shape
    hidden = params["wl0"].shape[1]
    num_center = params["wc_out"].shape[1]
    H2 = 2 * hidden

    # TODO(synk): the nn.Embedding gather stays in XLA (jnp.take); it is itself a module
    # output, so a scalar-prefetch Pallas gather would not remove any HBM traffic.
    ctx = contexts_left.reshape(N).astype(jnp.int32)
    emb = jnp.take(emb_table, ctx, axis=0).astype(f32)   # [N, E]
    x = features.reshape(N, F).astype(f32)               # free reshape; kernel reads f32

    # ---- fused / packed weights (tiny, constant-shaped folds, cheap under jit) ------------
    w0 = jnp.concatenate([params["wl0"], params["wc0_f"]], axis=1).astype(compute_dtype)
    we = jnp.concatenate(
        [jnp.zeros((emb_dim, hidden), f32), params["wc0_e"]], axis=1
    ).astype(compute_dtype)
    b0 = jnp.concatenate([params["bl0"], params["bc0"]], axis=1).astype(f32)

    zH = jnp.zeros((hidden, hidden), f32)
    w1 = jnp.block([[params["wl1"], zH], [zH, params["wc1"]]]).astype(compute_dtype)
    b1 = jnp.concatenate([params["bl1"], params["bc1"]], axis=1).astype(f32)

    woc = jnp.concatenate(
        [jnp.zeros((hidden, num_center), f32), params["wc_out"]], axis=0
    ).astype(compute_dtype)                                                   # [2H, C]
    wol = jnp.concatenate(
        [params["wl_out"], jnp.zeros((hidden, num_contexts), f32)], axis=0
    ).astype(compute_dtype)                                                   # [2H, L]
    boc = params["bc_out"].astype(f32)                                        # [1, C]
    bol = params["bl_out"].astype(f32)                                        # [1, L]

    # ---- generation-aware row tile + VMEM limit --------------------------------------------
    out_bytes = jnp.dtype(out_dtype).itemsize
    out_w = num_center + num_contexts
    # double-buffered bf16 weights + f32 biases (constant index_maps -> fetched once)
    weight_bytes = (
        2 * 2 * (F * H2 + emb_dim * H2 + H2 * H2 + H2 * out_w)
        + 2 * 4 * (2 * H2 + out_w)
    )
    per_row_bytes = (
        2 * 4 * (F + emb_dim)            # double-buffered f32 input tiles
        + 2 * out_bytes * out_w          # double-buffered output tiles
        + 12 * H2 + 6 * out_w + 2 * (F + emb_dim)   # in-kernel f32/bf16 temporaries
    )
    vmem_limit = min(_vmem_capacity_bytes() * 3 // 4, 64 * 1024 * 1024)  # v7x->48MiB, v5e/v6e->64MiB
    budget = (vmem_limit * 3) // 4
    tn_cap = max(256, ((budget - weight_bytes) // per_row_bytes) // 256 * 256)

    if N <= 512:
        # tiny problem (e.g. the demo): one block, no pipelining / padding overhead
        tn = _round_up(N, 8)
    else:
        tn = min(row_tile, tn_cap)
        if N <= tn:
            # keep >= 2 row blocks so v7x's two TensorCores can both be used
            tn = max(256, _round_up(pl.cdiv(N, 2), 256))
    grid = (pl.cdiv(N, tn),)   # ragged tail handled by Pallas' masked edge block

    mm_cols = F * H2 + emb_dim * H2 + H2 * H2 + H2 * out_w
    cost = pl.CostEstimate(
        flops=2 * N * mm_cols,
        transcendentals=0,
        bytes_accessed=N * (F + emb_dim) * 4 + N * out_w * out_bytes
        + 2 * mm_cols + 4 * (2 * H2 + out_w),
    )

    out_c, out_l = pl.pallas_call(
        _diphone_kernel,
        out_shape=(
            jax.ShapeDtypeStruct((N, num_center), out_dtype),
            jax.ShapeDtypeStruct((N, num_contexts), out_dtype),
        ),
        grid=grid,
        in_specs=[
            pl.BlockSpec((tn, F), lambda i: (i, 0)),
            pl.BlockSpec((tn, emb_dim), lambda i: (i, 0)),
            pl.BlockSpec((F, H2), lambda i: (0, 0)),
            pl.BlockSpec((emb_dim, H2), lambda i: (0, 0)),
            pl.BlockSpec((1, H2), lambda i: (0, 0)),
            pl.BlockSpec((H2, H2), lambda i: (0, 0)),
            pl.BlockSpec((1, H2), lambda i: (0, 0)),
            pl.BlockSpec((H2, num_center), lambda i: (0, 0)),
            pl.BlockSpec((1, num_center), lambda i: (0, 0)),
            pl.BlockSpec((H2, num_contexts), lambda i: (0, 0)),
            pl.BlockSpec((1, num_contexts), lambda i: (0, 0)),
        ],
        out_specs=(
            pl.BlockSpec((tn, num_center), lambda i: (i, 0)),
            pl.BlockSpec((tn, num_contexts), lambda i: (i, 0)),
        ),
        compiler_params=pltpu.CompilerParams(
            dimension_semantics=("parallel",),   # row blocks are independent (megacore)
            vmem_limit_bytes=vmem_limit,
        ),
        cost_estimate=cost,
    )(x, emb, w0, we, b0, w1, b1, woc, boc, wol, bol)

    # reshapes of contiguous [N, C] arrays are free; no slicing passes remain
    logits_center = out_c.reshape(B, T, num_center)
    logits_left = out_l.reshape(B, T, num_contexts)
    emb_out = emb.reshape(B, T, emb_dim)
    return logits_center, logits_left, emb_out


def reference_forward(features, contexts_left, params):
    """Pure-JAX f32 reference of FactoredDiphoneBlockV1.forward_factored (eval mode)."""
    B, T, F = features.shape
    x = features.reshape(-1, F).astype(jnp.float32)

    hl = jnp.maximum(x @ params["wl0"] + params["bl0"], 0.0)
    hl = jnp.maximum(hl @ params["wl1"] + params["bl1"], 0.0)
    logits_left = hl @ params["wl_out"] + params["bl_out"]

    emb = jnp.take(params["embedding"], contexts_left.reshape(-1).astype(jnp.int32), axis=0)
    xc = jnp.concatenate([x, emb], axis=-1)
    wc0 = jnp.concatenate([params["wc0_f"], params["wc0_e"]], axis=0)
    hc = jnp.maximum(xc @ wc0 + params["bc0"], 0.0)
    hc = jnp.maximum(hc @ params["wc1"] + params["bc1"], 0.0)
    logits_center = hc @ params["wc_out"] + params["bc_out"]

    return (
        logits_center.reshape(B, T, -1),
        logits_left.reshape(B, T, -1),
        emb.reshape(B, T, -1),
    )


def init_params(key, *, num_inputs, num_contexts, hidden_dim, emb_dim, num_center):
    """Deterministic synthetic parameters matching the module's __init__ shapes.
    context_mix_mlp_num_layers = 2 (two hidden Linear+ReLU, then output Linear).
    Linear weights stored transposed w.r.t. torch.nn.Linear, i.e. [in, out]."""
    ks = jax.random.split(key, 16)

    def linear(kw, kb, din, dout):
        scale = 1.0 / jnp.sqrt(jnp.float32(din))
        w = jax.random.uniform(kw, (din, dout), jnp.float32, -scale, scale)
        b = jax.random.uniform(kb, (1, dout), jnp.float32, -scale, scale)
        return w, b

    p = {}
    # left_context_encoder: num_inputs -> H -> H -> num_contexts
    p["wl0"], p["bl0"] = linear(ks[0], ks[1], num_inputs, hidden_dim)
    p["wl1"], p["bl1"] = linear(ks[2], ks[3], hidden_dim, hidden_dim)
    p["wl_out"], p["bl_out"] = linear(ks[4], ks[5], hidden_dim, num_contexts)
    # left_context_embedding: (num_contexts, emb_dim)
    p["embedding"] = jax.random.normal(ks[6], (num_contexts, emb_dim), jnp.float32)
    # center_encoder: (num_inputs + emb_dim) -> H -> H -> num_center
    # first layer's weight is split into the feature part and the embedding part
    wc0, p["bc0"] = linear(ks[7], ks[8], num_inputs + emb_dim, hidden_dim)
    p["wc0_f"] = wc0[:num_inputs, :]
    p["wc0_e"] = wc0[num_inputs:, :]
    p["wc1"], p["bc1"] = linear(ks[9], ks[10], hidden_dim, hidden_dim)
    p["wc_out"], p["bc_out"] = linear(ks[11], ks[12], hidden_dim, num_center)
    return p


if __name__ == "__main__":
    # Config (small, consistent with the module):
    B, T = 2, 8
    num_inputs = 32
    context_mix_mlp_dim = 64
    num_contexts = 16
    left_context_embedding_dim = 16
    num_hmm_states_per_phone = 3
    n_boundary_classes = 1  # boundary_class -> 1 class (get_center_dim)
    num_center = num_contexts * num_hmm_states_per_phone * n_boundary_classes  # 48

    key = jax.random.PRNGKey(0)
    k_feat, k_ctx, k_par = jax.random.split(key, 3)

    features = jax.random.normal(k_feat, (B, T, num_inputs), jnp.float32)
    contexts_left = jax.random.randint(k_ctx, (B, T), 0, num_contexts, jnp.int32)

    params = init_params(
        k_par,
        num_inputs=num_inputs,
        num_contexts=num_contexts,
        hidden_dim=context_mix_mlp_dim,
        emb_dim=left_context_embedding_dim,
        num_center=num_center,
    )

    logits_center, logits_left, emb_left = factored_diphone_forward(
        features, contexts_left, params
    )
    jax.block_until_ready((logits_center, logits_left, emb_left))

    assert logits_center.shape == (B, T, num_center)
    assert logits_left.shape == (B, T, num_contexts)
    assert emb_left.shape == (B, T, left_context_embedding_dim)

    # Correctness against pure-JAX f32 reference (bf16 MXU operands + bf16 logits store ->
    # loose tolerance; pass out_dtype=jnp.float32 for tighter numerics).
    ref_c, ref_l, ref_e = reference_forward(features, contexts_left, params)
    assert jnp.allclose(logits_center.astype(jnp.float32), ref_c, atol=5e-2, rtol=5e-2)
    assert jnp.allclose(logits_left.astype(jnp.float32), ref_l, atol=5e-2, rtol=5e-2)
    assert jnp.allclose(emb_left, ref_e, atol=1e-6, rtol=1e-6)

    print("KERNEL_OK")
</pallas_src>

<mosaic_0001>
module attributes {stable_mosaic.version = 11 : i64} {
  func.func @_diphone_kernel(%arg0: i32, %arg1: memref<16x32xf32, #tpu.memory_space<vmem>>, %arg2: memref<16x16xf32, #tpu.memory_space<vmem>>, %arg3: memref<32x128xbf16, #tpu.memory_space<vmem>>, %arg4: memref<16x128xbf16, #tpu.memory_space<vmem>>, %arg5: memref<1x128xf32, #tpu.memory_space<vmem>>, %arg6: memref<128x128xbf16, #tpu.memory_space<vmem>>, %arg7: memref<1x128xf32, #tpu.memory_space<vmem>>, %arg8: memref<128x48xbf16, #tpu.memory_space<vmem>>, %arg9: memref<1x48xf32, #tpu.memory_space<vmem>>, %arg10: memref<128x16xbf16, #tpu.memory_space<vmem>>, %arg11: memref<1x16xf32, #tpu.memory_space<vmem>>, %arg12: memref<16x48xbf16, #tpu.memory_space<vmem>>, %arg13: memref<16x16xbf16, #tpu.memory_space<vmem>>) attributes {dimension_semantics = [#tpu.dimension_semantics<parallel>], iteration_bounds = array<i64: 1>, scalar_prefetch = 0 : i64, scratch_operands = 0 : i64, tpu.core_type = #tpu.core_type<tc>, window_params = [{transform_indices = @transform_0, window_bounds = array<i64: 16, 32>}, {transform_indices = @transform_1, window_bounds = array<i64: 16, 16>}, {pipeline_mode = #tpu.pipeline_mode<synchronous>, transform_indices = @transform_2, window_bounds = array<i64: 32, 128>}, {pipeline_mode = #tpu.pipeline_mode<synchronous>, transform_indices = @transform_3, window_bounds = array<i64: 16, 128>}, {pipeline_mode = #tpu.pipeline_mode<synchronous>, transform_indices = @transform_4, window_bounds = array<i64: 1, 128>}, {pipeline_mode = #tpu.pipeline_mode<synchronous>, transform_indices = @transform_5, window_bounds = array<i64: 128, 128>}, {pipeline_mode = #tpu.pipeline_mode<synchronous>, transform_indices = @transform_6, window_bounds = array<i64: 1, 128>}, {pipeline_mode = #tpu.pipeline_mode<synchronous>, transform_indices = @transform_7, window_bounds = array<i64: 128, 48>}, {pipeline_mode = #tpu.pipeline_mode<synchronous>, transform_indices = @transform_8, window_bounds = array<i64: 1, 48>}, {pipeline_mode = #tpu.pipeline_mode<synchronous>, transform_indices = @transform_9, window_bounds = array<i64: 128, 16>}, {pipeline_mode = #tpu.pipeline_mode<synchronous>, transform_indices = @transform_10, window_bounds = array<i64: 1, 16>}, {transform_indices = @transform_11, window_bounds = array<i64: 16, 48>}, {transform_indices = @transform_12, window_bounds = array<i64: 16, 16>}]} {
    %c0 = arith.constant 0 : index
    %c0_0 = arith.constant 0 : index
    %0 = vector.load %arg1[%c0, %c0_0] : memref<16x32xf32, #tpu.memory_space<vmem>>, vector<16x32xf32>
    %1 = arith.truncf %0 : vector<16x32xf32> to vector<16x32xbf16>
    %c0_1 = arith.constant 0 : index
    %c0_2 = arith.constant 0 : index
    %2 = vector.load %arg2[%c0_1, %c0_2] : memref<16x16xf32, #tpu.memory_space<vmem>>, vector<16x16xf32>
    %3 = arith.truncf %2 : vector<16x16xf32> to vector<16x16xbf16>
    %c0_3 = arith.constant 0 : index
    %c0_4 = arith.constant 0 : index
    %4 = vector.load %arg3[%c0_3, %c0_4] : memref<32x128xbf16, #tpu.memory_space<vmem>>, vector<32x128xbf16>
    %cst = arith.constant dense<0.000000e+00> : vector<16x128xf32>
    %5 = tpu.matmul %1, %4, %cst {dimension_numbers = #tpu.dot_dimension_numbers<[1], [0], [0], [1], [0, 0, 1, 1], [], []>} : vector<16x32xbf16>, vector<32x128xbf16>, vector<16x128xf32> -> vector<16x128xf32>
    %c0_5 = arith.constant 0 : index
    %c0_6 = arith.constant 0 : index
    %6 = vector.load %arg4[%c0_5, %c0_6] : memref<16x128xbf16, #tpu.memory_space<vmem>>, vector<16x128xbf16>
    %cst_7 = arith.constant dense<0.000000e+00> : vector<16x128xf32>
    %7 = tpu.matmul %3, %6, %cst_7 {dimension_numbers = #tpu.dot_dimension_numbers<[1], [0], [0], [1], [0, 0, 1, 1], [], []>} : vector<16x16xbf16>, vector<16x128xbf16>, vector<16x128xf32> -> vector<16x128xf32>
    %8 = arith.addf %5, %7 : vector<16x128xf32>
    %c0_8 = arith.constant 0 : index
    %c0_9 = arith.constant 0 : index
    %9 = vector.load %arg5[%c0_8, %c0_9] : memref<1x128xf32, #tpu.memory_space<vmem>>, vector<1x128xf32>
    %10 = vector.broadcast %9 : vector<1x128xf32> to vector<16x128xf32>
    %11 = arith.addf %8, %10 : vector<16x128xf32>
    %cst_10 = arith.constant 0.000000e+00 : f32
    %12 = vector.broadcast %cst_10 : f32 to vector<16x128xf32>
    %13 = arith.maximumf %11, %12 : vector<16x128xf32>
    %14 = arith.truncf %13 : vector<16x128xf32> to vector<16x128xbf16>
    %c0_11 = arith.constant 0 : index
    %c0_12 = arith.constant 0 : index
    %15 = vector.load %arg6[%c0_11, %c0_12] : memref<128x128xbf16, #tpu.memory_space<vmem>>, vector<128x128xbf16>
    %cst_13 = arith.constant dense<0.000000e+00> : vector<16x128xf32>
    %16 = tpu.matmul %14, %15, %cst_13 {dimension_numbers = #tpu.dot_dimension_numbers<[1], [0], [0], [1], [0, 0, 1, 1], [], []>} : vector<16x128xbf16>, vector<128x128xbf16>, vector<16x128xf32> -> vector<16x128xf32>
    %c0_14 = arith.constant 0 : index
    %c0_15 = arith.constant 0 : index
    %17 = vector.load %arg7[%c0_14, %c0_15] : memref<1x128xf32, #tpu.memory_space<vmem>>, vector<1x128xf32>
    %18 = vector.broadcast %17 : vector<1x128xf32> to vector<16x128xf32>
    %19 = arith.addf %16, %18 : vector<16x128xf32>
    %cst_16 = arith.constant 0.000000e+00 : f32
    %20 = vector.broadcast %cst_16 : f32 to vector<16x128xf32>
    %21 = arith.maximumf %19, %20 : vector<16x128xf32>
    %22 = arith.truncf %21 : vector<16x128xf32> to vector<16x128xbf16>
    %c0_17 = arith.constant 0 : index
    %c0_18 = arith.constant 0 : index
    %23 = vector.load %arg8[%c0_17, %c0_18] : memref<128x48xbf16, #tpu.memory_space<vmem>>, vector<128x48xbf16>
    %cst_19 = arith.constant dense<0.000000e+00> : vector<16x48xf32>
    %24 = tpu.matmul %22, %23, %cst_19 {dimension_numbers = #tpu.dot_dimension_numbers<[1], [0], [0], [1], [0, 0, 1, 1], [], []>} : vector<16x128xbf16>, vector<128x48xbf16>, vector<16x48xf32> -> vector<16x48xf32>
    %c0_20 = arith.constant 0 : index
    %c0_21 = arith.constant 0 : index
    %25 = vector.load %arg9[%c0_20, %c0_21] : memref<1x48xf32, #tpu.memory_space<vmem>>, vector<1x48xf32>
    %26 = vector.broadcast %25 : vector<1x48xf32> to vector<16x48xf32>
    %27 = arith.addf %24, %26 : vector<16x48xf32>
    %28 = arith.truncf %27 : vector<16x48xf32> to vector<16x48xbf16>
    %c0_22 = arith.constant 0 : index
    %c0_23 = arith.constant 0 : index
    %29 = vector.load %arg12[%c0_22, %c0_23] : memref<16x48xbf16, #tpu.memory_space<vmem>>, vector<16x48xbf16>
    tpu.vector_store %arg12[%c0_22, %c0_23], %28 {strides = array<i32>} : memref<16x48xbf16, #tpu.memory_space<vmem>>, vector<16x48xbf16>,
    %c0_24 = arith.constant 0 : index
    %c0_25 = arith.constant 0 : index
    %30 = vector.load %arg10[%c0_24, %c0_25] : memref<128x16xbf16, #tpu.memory_space<vmem>>, vector<128x16xbf16>
    %cst_26 = arith.constant dense<0.000000e+00> : vector<16x16xf32>
    %31 = tpu.matmul %22, %30, %cst_26 {dimension_numbers = #tpu.dot_dimension_numbers<[1], [0], [0], [1], [0, 0, 1, 1], [], []>} : vector<16x128xbf16>, vector<128x16xbf16>, vector<16x16xf32> -> vector<16x16xf32>
    %c0_27 = arith.constant 0 : index
    %c0_28 = arith.constant 0 : index
    %32 = vector.load %arg11[%c0_27, %c0_28] : memref<1x16xf32, #tpu.memory_space<vmem>>, vector<1x16xf32>
    %33 = vector.broadcast %32 : vector<1x16xf32> to vector<16x16xf32>
    %34 = arith.addf %31, %33 : vector<16x16xf32>
    %35 = arith.truncf %34 : vector<16x16xf32> to vector<16x16xbf16>
    %c0_29 = arith.constant 0 : index
    %c0_30 = arith.constant 0 : index
    %36 = vector.load %arg13[%c0_29, %c0_30] : memref<16x16xbf16, #tpu.memory_space<vmem>>, vector<16x16xbf16>
    tpu.vector_store %arg13[%c0_29, %c0_30], %35 {strides = array<i32>} : memref<16x16xbf16, #tpu.memory_space<vmem>>, vector<16x16xbf16>,
    return
  }
  func.func @transform_0(%arg0: i32) -> (i32, i32) {
    %c0_i32 = arith.constant 0 : i32
    %c0_i32_0 = arith.constant 0 : i32
    return %arg0, %c0_i32 : i32, i32
  }
  func.func @transform_1(%arg0: i32) -> (i32, i32) {
    %c0_i32 = arith.constant 0 : i32
    %c0_i32_0 = arith.constant 0 : i32
    return %arg0, %c0_i32 : i32, i32
  }
  func.func @transform_2(%arg0: i32) -> (i32, i32) {
    %c0_i32 = arith.constant 0 : i32
    %c0_i32_0 = arith.constant 0 : i32
    %c0_i32_1 = arith.constant 0 : i32
    return %c0_i32, %c0_i32_0 : i32, i32
  }
  func.func @transform_3(%arg0: i32) -> (i32, i32) {
    %c0_i32 = arith.constant 0 : i32
    %c0_i32_0 = arith.constant 0 : i32
    %c0_i32_1 = arith.constant 0 : i32
    return %c0_i32, %c0_i32_0 : i32, i32
  }
  func.func @transform_4(%arg0: i32) -> (i32, i32) {
    %c0_i32 = arith.constant 0 : i32
    %c0_i32_0 = arith.constant 0 : i32
    %c0_i32_1 = arith.constant 0 : i32
    return %c0_i32, %c0_i32_0 : i32, i32
  }
  func.func @transform_5(%arg0: i32) -> (i32, i32) {
    %c0_i32 = arith.constant 0 : i32
    %c0_i32_0 = arith.constant 0 : i32
    %c0_i32_1 = arith.constant 0 : i32
    return %c0_i32, %c0_i32_0 : i32, i32
  }
  func.func @transform_6(%arg0: i32) -> (i32, i32) {
    %c0_i32 = arith.constant 0 : i32
    %c0_i32_0 = arith.constant 0 : i32
    %c0_i32_1 = arith.constant 0 : i32
    return %c0_i32, %c0_i32_0 : i32, i32
  }
  func.func @transform_7(%arg0: i32) -> (i32, i32) {
    %c0_i32 = arith.constant 0 : i32
    %c0_i32_0 = arith.constant 0 : i32
    %c0_i32_1 = arith.constant 0 : i32
    return %c0_i32, %c0_i32_0 : i32, i32
  }
  func.func @transform_8(%arg0: i32) -> (i32, i32) {
    %c0_i32 = arith.constant 0 : i32
    %c0_i32_0 = arith.constant 0 : i32
    %c0_i32_1 = arith.constant 0 : i32
    return %c0_i32, %c0_i32_0 : i32, i32
  }
  func.func @transform_9(%arg0: i32) -> (i32, i32) {
    %c0_i32 = arith.constant 0 : i32
    %c0_i32_0 = arith.constant 0 : i32
    %c0_i32_1 = arith.constant 0 : i32
    return %c0_i32, %c0_i32_0 : i32, i32
  }
  func.func @transform_10(%arg0: i32) -> (i32, i32) {
    %c0_i32 = arith.constant 0 : i32
    %c0_i32_0 = arith.constant 0 : i32
    %c0_i32_1 = arith.constant 0 : i32
    return %c0_i32, %c0_i32_0 : i32, i32
  }
  func.func @transform_11(%arg0: i32) -> (i32, i32) {
    %c0_i32 = arith.constant 0 : i32
    %c0_i32_0 = arith.constant 0 : i32
    return %arg0, %c0_i32 : i32, i32
  }
  func.func @transform_12(%arg0: i32) -> (i32, i32) {
    %c0_i32 = arith.constant 0 : i32
    %c0_i32_0 = arith.constant 0 : i32
    return %arg0, %c0_i32 : i32, i32
  }
}

</mosaic_0001>

<bundles_post_ra>
// kernel: factored_diphone_forward.1
= control target key start
LH: loop header
LB: loop body
LE: loop exit
PB: predicated region body
PF: predicated region fallthrough
CT: control target
= control target key end

     0   :  { %18 = vsyncpa [#allocation3], 0  ;;  %v796_v1 = vmov 0.0   ;;  %vm797_vm0 = vmmov 0   ;;  %vm61_vm1 = vcmask 130048   ;;  %vm118_vm2 = vcmask 261120   ;;  %s1044_s0 = inlined_call_operand.vmem [shape: f32[16,32], index: 0, kind: input, shape index: {}]   ;;  %s1045_s1 = inlined_call_operand.vmem [shape: f32[16,16], index: 1, kind: input, shape index: {}]   ;;  %s1046_s2 = inlined_call_operand.vmem [shape: bf16[32,128], index: 2, kind: input, shape index: {}]   ;;  %s1047_s3 = inlined_call_operand.vmem [shape: bf16[16,128], index: 3, kind: input, shape index: {}]   ;;  %s1048_s4 = inlined_call_operand.vmem [shape: f32[1,128], index: 4, kind: input, shape index: {}]   ;;  %s1049_s5 = inlined_call_operand.vmem [shape: bf16[128,128], index: 5, kind: input, shape index: {}]   ;;  %s1050_s6 = inlined_call_operand.vmem [shape: f32[1,128], index: 6, kind: input, shape index: {}]   ;;  %s1051_s7 = inlined_call_operand.vmem [shape: bf16[128,48], index: 7, kind: input, shape index: {}]   ;;  %s1052_s8 = inlined_call_operand.vmem [shape: f32[1,48], index: 8, kind: input, shape index: {}]   ;;  %s1053_s9 = inlined_call_operand.vmem [shape: bf16[128,16], index: 9, kind: input, shape index: {}]   ;;  %s1054_s10 = inlined_call_operand.vmem [shape: f32[1,16], index: 10, kind: input, shape index: {}]   ;;  %s1055_s11 = inlined_call_operand.hbm [shape: bf16[16,48], index: 11, kind: output, shape index: {0}]   ;;  %s1056_s12 = inlined_call_operand.hbm [shape: bf16[16,16], index: 12, kind: output, shape index: {1}]  }
   0x1   :  { %v721_v0 = vld [vmem:[%s1047_s3] sm:$0xff]   ;;  %641 = vmatprep.subr.bf16.mxu1 %v796_v1  ;;  %v47_v3 = vld [vmem:[%s1045_s1 + $0x8] sm:$0xff]  ;;  %655 = vmatprep.subr.bf16.mxu0 %v796_v1  ;;  %v726_v12 = vld [vmem:[%s1049_s5 + $0x10] sm:$0xff]  }
   0x2   :  { %v46_v2 = vld [vmem:[%s1045_s1] sm:$0xff]  ;;  %642 = vmatpush3.bf16.msra.mxu1 %v721_v0  ;;  %643 = vmatprep.mubr.msk.bf16.mxu1 %vm797_vm0, %v796_v1  ;;  %v723_v6 = vld [vmem:[%s1046_s2 + $0x8] sm:$0xff]  }
   0x3   :  { %v48_v4 = vpack.c.bf16 %v47_v3, %v46_v2  ;;  %v722_v5 = vld [vmem:[%s1046_s2] sm:$0xff]   ;;  %647 = vmatprep.subr.bf16.mxu1 %v796_v1  ;;  %671 = vmatprep.mubr.msk.bf16.mxu0 %vm797_vm0, %v796_v1  ;;  %v44_v9 = vld [vmem:[%s1044_s0 + $0x8] sm:$0xff] }
   0x4   :  { %v43_v7 = vld [vmem:[%s1044_s0] sm:$0xff]  ;;  %v725_v10 = vld [vmem:[%s1049_s5 + $0x8] sm:$0xff]  }
   0x5   :  { %644 = vmatmul.mubr.msk.bf16.vlgmr.msra.gmra.mrb[0].mxu1 %vm61_vm1, %v48_v4  ;;  %v724_v8 = vld [vmem:[%s1049_s5] sm:$0xff]   ;;  %v45_v11 = vpack.c.bf16 %v44_v9, %v43_v7 }
   0x6   :  { %648 = vmatpush3.bf16.msra.mxu1 %v722_v5  ;;  %651 = vmatprep.mubr.msk.bf16.mxu1 %vm797_vm0, %v796_v1 }
   0x7   :  { %649 = vmatprep.subr.bf16.mxu1 %v796_v1  ;;  %656 = vmatpush3.bf16.msra.mxu0 %v724_v8 }
   0x8   :  { %657 = vmatprep.subr.bf16.mxu0 %v796_v1 }
   0xa   :  { %650 = vmatpush3.bf16.msra.mxu1 %v723_v6 }
   0xb   :  { %658 = vmatpush3.bf16.msra.mxu0 %v725_v10  ;;  %675 = vmatprep.subr.bf16.mxu1 %v796_v1 }
   0xc   :  { %659 = vmatprep.subr.bf16.mxu0 %v796_v1 }
   0xd   :  { %652 = vmatmul.mubr.msk.bf16.vlgmr.msra.gmra.mrb[4].mxu1 %vm118_vm2, %v45_v11 }
   0xe   :  { %691 = vmatprep.mubr.msk.bf16.mxu1 %vm797_vm0, %v796_v1 }
   0xf   :  { %660 = vmatpush3.bf16.msra.mxu0 %v726_v12 }
  0x10   :  { %661 = vmatprep.subr.bf16.mxu0 %v796_v1 }
  0x11   :  { %19 = vsyncpa [#allocation5], 0  ;;  %v727_v13 = vld [vmem:[%s1049_s5 + $0x18] sm:$0xff]   ;;  %v728_v14 = vld [vmem:[%s1049_s5 + $0x20] sm:$0xff]   ;;  %vm410_vm3 = vcmask 388096   ;;  %vm533_vm4 = vcmask 125952  }
  0x12   :  { %v729_v15 = vld [vmem:[%s1049_s5 + $0x28] sm:$0xff]   ;;  %v730_v16 = vld [vmem:[%s1049_s5 + $0x30] sm:$0xff]   ;;  %v731_v17 = vld [vmem:[%s1049_s5 + $0x38] sm:$0xff]  }
  0x13   :  { %662 = vmatpush3.bf16.msra.mxu0 %v727_v13  ;;  %v732_v18 = vld [vmem:[%s1051_s7] sm:$0xff]   ;;  %v734_v19 = vld [vmem:[%s1051_s7 + $0x8] sm:$0xff]   ;;  %v736_v20 = vld [vmem:[%s1051_s7 + $0x10] sm:$0xff]  }
  0x14   :  { %663 = vmatprep.subr.bf16.mxu0 %v796_v1  ;;  %676 = vmatpush3.bf16.msra.mxu1 %v732_v18  ;;  %v738_v21 = vld [vmem:[%s1051_s7 + $0x18] sm:$0xff]   ;;  %v740_v22 = vld [vmem:[%s1051_s7 + $0x20] sm:$0xff]   ;;  %v742_v23 = vld [vmem:[%s1051_s7 + $0x28] sm:$0xff]  }
  0x15   :  { %677 = vmatprep.subr.bf16.mxu1 %v796_v1  ;;  %v573_v29 = vld [vmem:[%s1048_s4] ss:$0 sm:$0xff]  ;;  %v735_v41 = vld [vmem:[%s1053_s9 + $0x8] sm:$0xff]   ;;  %v737_v42 = vld [vmem:[%s1053_s9 + $0x10] sm:$0xff]  }
  0x16   :  { %v733_v39 = vld [vmem:[%s1053_s9] sm:$0xff]   ;;  %v739_v43 = vld [vmem:[%s1053_s9 + $0x18] sm:$0xff]   ;;  %v743_v45 = vld [vmem:[%s1053_s9 + $0x28] sm:$0xff]  }
  0x17   :  { %664 = vmatpush3.bf16.msra.mxu0 %v728_v14  ;;  %v741_v44 = vld [vmem:[%s1053_s9 + $0x20] sm:$0xff]   ;;  %v744_v46 = vld [vmem:[%s1051_s7 + $0x30] sm:$0xff]   ;;  %v746_v48 = vld [vmem:[%s1051_s7 + $0x38] sm:$0xff]  }
  0x18   :  { %665 = vmatprep.subr.bf16.mxu0 %v796_v1  ;;  %678 = vmatpush3.bf16.msra.mxu1 %v734_v19  ;;  %v745_v47 = vld [vmem:[%s1053_s9 + $0x30] sm:$0xff]   ;;  %v747_v49 = vld [vmem:[%s1053_s9 + $0x38] sm:$0xff]   ;;  %v574_v50 = vld [vmem:[%s1050_s6] ss:$0 sm:$0xff]  ;;  %s798_s6 = smov [#allocation2]  }
  0x19   :  { %679 = vmatprep.subr.bf16.mxu1 %v796_v1  ;;  %v583_v60 = vld [vmem:[%s1052_s8] ss:$0 sm:$0xff]  ;;  %s541_s20 = sshll.u32 %s798_s6, 4  ;;  %s799_s8 = smov [#allocation4]   ;;  %s542_s20 = int_to_ptr.vmem [resolvable:$true] %s541_s20 }
  0x1a   :  { %v594_v61 = vld [vmem:[%s1054_s10] ss:$0 sm:$0xff]  ;;  %s553_s10 = sshll.u32 %s799_s8, 4  ;;  %s748_s21 = scalar_lea.vmem %s542_s20, 128  ;;  %s1011_s10 = int_to_ptr.vmem [resolvable:$true] %s553_s10 }
  0x1b   :  { %666 = vmatpush3.bf16.msra.mxu0 %v729_v15  ;;  %p749_p0 = scmp.ne.s32.totalorder %s542_s20, %s748_s21  ;;  %p753_p1 = scmp.lt.s32.totalorder %s542_s20, %s542_s20 }
  0x1c   :  { %667 = vmatprep.subr.bf16.mxu0 %v796_v1  ;;  %680 = vmatpush3.bf16.msra.mxu1 %v736_v20  ;;  %p754_p2 = scmp.lt.s32.totalorder %s748_s21, %s748_s21 }
  0x1d   :  { %681 = vmatprep.subr.bf16.mxu1 %v796_v1 }
  0x1e   :  { %p755_p3 = por %p754_p2, %p753_p1 }
  0x1f   :  { %668 = vmatpush3.bf16.msra.mxu0 %v730_v16 }
  0x20   :  { %669 = vmatprep.subr.bf16.mxu0 %v796_v1  ;;  %682 = vmatpush3.bf16.msra.mxu1 %v738_v21  ;;  %p756_p4 = pnand %p755_p3, %p749_p0 }
  0x21   :  { %683 = vmatprep.subr.bf16.mxu1 %v796_v1 }
  0x23   :  { %670 = vmatpush3.bf16.msra.mxu0 %v731_v17 }
  0x24   :  { %695 = vmatprep.subr.bf16.mxu0 %v796_v1  ;;  %684 = vmatpush3.bf16.msra.mxu1 %v740_v22 }
  0x25   :  { %685 = vmatprep.subr.bf16.mxu1 %v796_v1 }
  0x28   :  { %686 = vmatpush3.bf16.msra.mxu1 %v742_v23 }
  0x29   :  { %687 = vmatprep.subr.bf16.mxu1 %v796_v1 }
  0x2c   :  { %688 = vmatpush3.bf16.msra.mxu1 %v744_v46 }
  0x2d   :  { %689 = vmatprep.subr.bf16.mxu1 %v796_v1 }
  0x30   :  { %690 = vmatpush3.bf16.msra.mxu1 %v746_v48 }
  0xd8   :  { %v99_v24 = vpop.f32.mrb[0].mxu1 }
  0xd9   :  { %v645_v25 = vpop.f32.mrb[1].mxu1 }
  0xda   :  { %v102_v26 = vpop.f32.mrb[2].mxu1 }
  0xdb   :  { %v646_v27 = vpop.f32.mrb[3].mxu1 }
  0xe0   :  { %v156_v28 = vpop.f32.mrb[4].mxu1 }
  0xe1   :  { %v157_v30 = vadd.f32 %v156_v28, %v99_v24  ;;  %v653_v31 = vpop.f32.mrb[5].mxu1 }
  0xe2   :  { %v159_v32 = vpop.f32.mrb[6].mxu1 }
  0xe3   :  { %v170_v33 = vadd.f32 %v573_v29, %v157_v30  ;;  %v160_v34 = vadd.f32 %v159_v32, %v102_v26  ;;  %v654_v35 = vpop.f32.mrb[7].mxu1 }
  0xe5   :  { %v171_v36 = vadd.f32 %v573_v29, %v160_v34  ;;  %v172_v37 = vmax.f32 %v170_v33, 0.0 }
  0xe7   :  { %v173_v38 = vmax.f32 %v171_v36, 0.0 }
  0xe9   :  { %v174_v40 = vpack.c.bf16 %v173_v38, %v172_v37 }
  0xeb   :  { %672 = vmatmul.mubr.bf16.vlgmr.msra.gmra.mrb[0].mxu0 %v174_v40 }
  0xec   :  { %696 = vmatpush3.bf16.msra.mxu0 %v733_v39  ;;  %711 = vmatprep.mubr.msk.bf16.mxu0 %vm797_vm0, %v796_v1 }
  0xed   :  { %697 = vmatprep.subr.bf16.mxu0 %v796_v1 }
  0xf0   :  { %698 = vmatpush3.bf16.msra.mxu0 %v735_v41 }
  0xf1   :  { %699 = vmatprep.subr.bf16.mxu0 %v796_v1 }
  0xf4   :  { %700 = vmatpush3.bf16.msra.mxu0 %v737_v42 }
  0xf5   :  { %701 = vmatprep.subr.bf16.mxu0 %v796_v1 }
  0xf8   :  { %702 = vmatpush3.bf16.msra.mxu0 %v739_v43 }
  0xf9   :  { %703 = vmatprep.subr.bf16.mxu0 %v796_v1 }
  0xfc   :  { %704 = vmatpush3.bf16.msra.mxu0 %v741_v44 }
  0xfd   :  { %705 = vmatprep.subr.bf16.mxu0 %v796_v1 }
 0x100   :  { %706 = vmatpush3.bf16.msra.mxu0 %v743_v45 }
 0x101   :  { %707 = vmatprep.subr.bf16.mxu0 %v796_v1 }
 0x104   :  { %708 = vmatpush3.bf16.msra.mxu0 %v745_v47 }
 0x105   :  { %709 = vmatprep.subr.bf16.mxu0 %v796_v1 }
 0x108   :  { %710 = vmatpush3.bf16.msra.mxu0 %v747_v49 }
 0x1be   :  { %v280_v51 = vpop.f32.mrb[0].mxu0 }
 0x1bf   :  { %v281_v52 = vadd.f32 %v574_v50, %v280_v51  ;;  %v673_v53 = vpop.f32.mrb[1].mxu0 }
 0x1c0   :  { %v283_v54 = vpop.f32.mrb[2].mxu0 }
 0x1c1   :  { %v284_v55 = vadd.f32 %v574_v50, %v283_v54  ;;  %v674_v56 = vpop.f32.mrb[3].mxu0  ;;  %v287_v57 = vmax.f32 %v281_v52, 0.0 }
 0x1c3   :  { %v288_v58 = vmax.f32 %v284_v55, 0.0 }
 0x1c5   :  { %v289_v59 = vpack.c.bf16 %v288_v58, %v287_v57 }
 0x1c7   :  { %692 = vmatmul.mubr.bf16.vlgmr.msra.gmra.mrb[8].mxu1 %v289_v59  ;;  %712 = vmatmul.mubr.bf16.vlgmr.msra.gmra.mrb[4].mxu0 %v289_v59 }
 0x29a   :  { %v395_v62 = vpop.f32.mrb[8].mxu1  ;;  %v518_v63 = vpop.f32.mrb[4].mxu0 }
 0x29b   :  { %v396_v0 = vadd.f32 %v583_v60, %v395_v62  ;;  %v519_v1 = vadd.f32 %v594_v61, %v518_v63  ;;  %v693_v2 = vpop.f32.mrb[9].mxu1  ;;  %v713_v3 = vpop.f32.mrb[5].mxu0 }
 0x29c   :  { %v398_v4 = vpop.f32.mrb[10].mxu1  ;;  %v521_v5 = vpop.f32.mrb[6].mxu0 }
 0x29d   :  { %v605_v6 = vpack.c.bf16 %v396_v0, %v396_v0  ;;  %v607_v7 = vpack.c.bf16 %v519_v1, %v519_v1  ;;  %v399_v8 = vadd.f32 %v583_v60, %v398_v4  ;;  %v522_v9 = vadd.f32 %v594_v61, %v521_v5  ;;  %v694_v10 = vpop.f32.mrb[11].mxu1  ;;  %v714_v11 = vpop.f32.mrb[7].mxu0 }
 0x29f   :  { %411 = vst.msk [vmem:[#allocation2] sm:$0xf] %vm410_vm3, %v605_v6  ;;  %v606_v12 = vpack.c.bf16 %v399_v8, %v399_v8  ;;  %v608_v13 = vpack.c.bf16 %v522_v9, %v522_v9 }
 0x2a0   :  { %534 = vst.msk [vmem:[#allocation4] sm:$0xf] %vm533_vm4, %v607_v7 }
 0x2a1   :  { %412 = vst.msk [vmem:[#allocation2 + $0x4] sm:$0xf] %vm410_vm3, %v606_v12 }
 0x2a2   :  { %535 = vst.msk [vmem:[#allocation4 + $0x4] sm:$0xf] %vm533_vm4, %v608_v13 }
 0x2a3   :  { %759 = shalt.err (!%p756_p4)
}
 0x2a4   :  { %s760_s4 = scalar_lea.hbm %s1055_s11, 128 }
 0x2a5   :  { %p761_p5 = scmp.ne.s32.totalorder %s1055_s11, %s760_s4  ;;  %p764_p6 = scmp.lt.u32.totalorder %s760_s4, %s1055_s11 }
 0x2a7   :  { %p766_p7 = pnand %p764_p6, %p761_p5 }
 0x2a9   :  { %769 = shalt.err (!%p766_p7)
}
 0x2aa   :  { %s800_s27 = smov 64   ;;  %s801_s28 = smov 4  }
 0x2ab   :  { %547 = dma.vmem_to_hbm [thread:$0]  %s542_s20, 128, %s1055_s11, [#allocation3], %s800_s27, %s800_s27, %s801_s28  }
 0x2ac   :  { %s770_s30 = scalar_lea.vmem %s1011_s10, 128  ;;  %p775_p9 = scmp.lt.s32.totalorder %s1011_s10, %s1011_s10 }
 0x2ad   :  { %p771_p8 = scmp.ne.s32.totalorder %s1011_s10, %s770_s30  ;;  %p776_p10 = scmp.lt.s32.totalorder %s770_s30, %s770_s30 }
 0x2af   :  { %p777_p11 = por %p776_p10, %p775_p9 }
 0x2b1   :  { %p778_p12 = pnand %p777_p11, %p771_p8 }
 0x2b3   :  { %781 = shalt.err (!%p778_p12)
}
 0x2b4   :  { %s782_s5 = scalar_lea.hbm %s1056_s12, 128 }
 0x2b5   :  { %p783_p13 = scmp.ne.s32.totalorder %s1056_s12, %s782_s5  ;;  %p786_p0 = scmp.lt.u32.totalorder %s782_s5, %s1056_s12 }
 0x2b7   :  { %p788_p1 = pnand %p786_p0, %p783_p13 }
 0x2b9   :  { %791 = shalt.err (!%p788_p1)
}
 0x2ba   :  { %559 = dma.vmem_to_hbm [thread:$0]  %s1011_s10, 128, %s1056_s12, [#allocation5], %s800_s27, %s800_s27, %s801_s28  }
 0x2bb   :  { %792 = dma.done.wait [#allocation3], 128  }
 0x2bc   :  { %793 = vsyncadd [#allocation3], 4294967168 }
 0x2bd   :  { %794 = dma.done.wait [#allocation5], 128  }
 0x2be   :  { %795 = vsyncadd [#allocation5], 4294967168 }
 0x2bf   :  { %566 = vsyncpa [#allocation3], 1 }
 0x2c0   :  { %567 = vsyncpa [#allocation5], 1 }

</bundles_post_ra>
